<compile_context>
chip_gen: v5e
topology: v5e:2x2
jax: 0.10.0
libtpu: 0.0.40
codegen_flags: <defaults>
</compile_context>

<pallas_src>
from functools import partial

import jax
import jax.numpy as jnp
from jax import lax
from jax.experimental import pallas as pl
from jax.experimental.pallas import tpu as pltpu


# ----------------------------- fused kernel --------------------------------- #

def _mha_kernel(head, hd, pad_token, with_qk, compute_dtype, approx_recip,
                x_ref, wqkv_ref, bqkv_ref, wo_ref, bo_ref, fz_ref,
                out_ref, *rest):
    if with_qk:
        qk_ref = rest[0]
        q_s, k_s, v_s, wv_s = rest[1:]
    else:
        qk_ref = None
        q_s, k_s, v_s, wv_s = rest

    h = pl.program_id(1)
    f32 = jnp.float32
    D = head * hd

    def cast(v):
        return v if v.dtype == compute_dtype else v.astype(compute_dtype)

    # ---- QKV projection: once per batch element (h == 0) -------------------- #
    @pl.when(h == 0)
    def _():
        x = cast(x_ref[0])                                          # (S, D)
        qkv = jnp.dot(x, wqkv_ref[...],
                      preferred_element_type=f32) + bqkv_ref[...]   # (S, 3D) f32
        # Split per head onto the LEADING dim of the scratches (static lane
        # slices here; the per-head reads below are leading-dim dynamic indexes).
        for g in range(head):
            o = g * hd
            q_s[g] = qkv[:, o:o + hd]            # scale^2 already folded into wq
            k_s[g] = qkv[:, D + o:D + o + hd]
            v_s[g] = qkv[:, 2 * D + o:2 * D + o + hd]

    # ---- one head per grid step --------------------------------------------- #
    qh = q_s[h]                                                     # (S, hd)
    kh = k_s[h]
    vh = v_s[h]

    # pad-token zscale: scaling key row j before the dot == scaling qk column j
    # after it (identical to the PyTorch module's post-hoc column scaling).
    fz = fz_ref[0, 0]                                               # SMEM scalar
    zs = jnp.where(kh[:, 0:1] == pad_token, fz, f32(1.0))           # (S, 1)
    kh_z = kh * zs

    # q @ k^T without materializing k^T (contract last dims on the MXU).
    s = lax.dot_general(cast(qh), cast(kh_z), (((1,), (1,)), ((), ())),
                        preferred_element_type=f32)                 # (S, S) f32
    if with_qk:
        qk_ref[0, 0] = s.astype(qk_ref.dtype)

    # Softmax entirely in f32. Exact normalization by default; the approximate
    # EUP reciprocal is opt-in only (it caused the previous tolerance failure).
    m = jnp.max(s, axis=-1, keepdims=True)
    e = jnp.exp(s - m)
    l = jnp.sum(e, axis=-1, keepdims=True)
    if approx_recip:
        w = e * pl.reciprocal(l, approx=True)
    else:
        w = e / l

    wv_s[h] = jnp.dot(cast(w), cast(vh), preferred_element_type=f32)  # (S, hd)

    # ---- fused output projection: ONE K=D MXU dot at the last head ---------- #
    @pl.when(h == head - 1)
    def _():
        wv = jnp.concatenate([wv_s[g] for g in range(head)], axis=-1)  # (S, D)
        out = jnp.dot(cast(wv), wo_ref[...],
                      preferred_element_type=f32) + bo_ref[...]
        out_ref[0] = out.astype(out_ref.dtype)


# ------------------------------- wrapper ------------------------------------ #

def multihead_a_forward(x, params, head, *, return_qk=True,
                        compute_dtype=jnp.float32, qk_dtype=jnp.float32,
                        approx_softmax_recip=False):
    """Pallas implementation of MultiheadA.forward(x) with xa=None, mask=None,
    rotary_emb=False, return_attn=False.  Returns (out, qk); qk is None when
    return_qk=False (hot path, skips the O(B*H*S^2) write-back)."""
    B, S, D = x.shape
    hd = D // head
    scale = float(hd) ** (-0.25)
    scale2 = scale * scale
    f32 = jnp.float32

    # nn.Linear stores (out, in) -> transpose.  Fold scale^2 into wq / bq so the
    # kernel never multiplies activations by the softmax scale.
    wq_t = params["wq"].T.astype(f32) * f32(scale2)
    bq = params["bq"].astype(f32) * f32(scale2)
    wqkv_t = jnp.concatenate(
        [wq_t, params["wk"].T.astype(f32), params["wv"].T.astype(f32)], axis=1)   # (D, 3D)
    bqkv = jnp.concatenate(
        [bq, jnp.zeros((D,), f32), params["bv"].astype(f32)]).reshape(1, 3 * D)
    wo_t = params["wo"].T.astype(f32)                                              # (D, D)
    bo = params["bo"].astype(f32).reshape(1, D)

    # Pre-cast MXU operands once in the wrapper (no per-step VPU cast in-kernel).
    wqkv_t = wqkv_t.astype(compute_dtype)
    wo_t = wo_t.astype(compute_dtype)

    # fzero = clamp(softplus(fzero_param), min, max)  -> SMEM scalar.
    fz = jnp.clip(jax.nn.softplus(params["fzero"]), params["min"], params["max"])
    fz = fz.reshape(1, 1).astype(f32)

    kernel = partial(_mha_kernel, head, hd, 0.0, return_qk, compute_dtype,
                     approx_softmax_recip)

    # Explicit VMEM budget derived from the chosen block / scratch sizes.
    w_isz = jnp.dtype(compute_dtype).itemsize
    vmem_bytes = (2 * S * D * 4                              # x (double-buffered)
                  + 2 * S * D * 4                            # out block
                  + 2 * (D * 3 * D + D * D) * w_isz          # weights
                  + 2 * 4 * D * 4                            # biases
                  + 4 * head * S * hd * 4                    # q/k/v/wv scratch
                  + 4 * S * S * 4)                           # score tile + temps
    if return_qk:
        vmem_bytes += 2 * S * S * jnp.dtype(qk_dtype).itemsize
    vmem_limit = int(min(max(2 * vmem_bytes, 4 << 20), 100 << 20))

    in_specs = [
        pl.BlockSpec((1, S, D), lambda b, h: (b, 0, 0)),        # x (same block over h)
        pl.BlockSpec((D, 3 * D), lambda b, h: (0, 0)),          # [wq*s^2 | wk | wv]^T
        pl.BlockSpec((1, 3 * D), lambda b, h: (0, 0)),          # [bq*s^2 | 0 | bv]
        pl.BlockSpec((D, D), lambda b, h: (0, 0)),              # wo^T
        pl.BlockSpec((1, D), lambda b, h: (0, 0)),              # bo
        pl.BlockSpec((1, 1), lambda b, h: (0, 0),
                     memory_space=pltpu.MemorySpace.SMEM),      # clamped fzero
    ]
    scratch_shapes = [
        pltpu.VMEM((head, S, hd), f32),   # q (scale folded in)
        pltpu.VMEM((head, S, hd), f32),   # k
        pltpu.VMEM((head, S, hd), f32),   # v
        pltpu.VMEM((head, S, hd), f32),   # per-head attention output
    ]

    if return_qk:
        out_shape = (jax.ShapeDtypeStruct((B, S, D), f32),
                     jax.ShapeDtypeStruct((B, head, S, S), qk_dtype))
        out_specs = (pl.BlockSpec((1, S, D), lambda b, h: (b, 0, 0)),
                     pl.BlockSpec((1, 1, S, S), lambda b, h: (b, h, 0, 0)))
    else:
        out_shape = jax.ShapeDtypeStruct((B, S, D), f32)
        out_specs = pl.BlockSpec((1, S, D), lambda b, h: (b, 0, 0))

    outs = pl.pallas_call(
        kernel,
        out_shape=out_shape,
        grid=(B, head),
        in_specs=in_specs,
        out_specs=out_specs,
        scratch_shapes=scratch_shapes,
        compiler_params=pltpu.CompilerParams(
            dimension_semantics=("parallel", "arbitrary"),
            vmem_limit_bytes=vmem_limit),
    )(x.astype(f32), wqkv_t, bqkv, wo_t, bo, fz)

    if return_qk:
        out, qk = outs
        return out, qk
    return outs, None


# ------------------------- reference (pure JAX) ------------------------------ #

def _ref_forward(x, params, head):
    with jax.default_matmul_precision("highest"):
        B, S, D = x.shape
        hd = D // head
        scale = float(hd) ** (-0.25)
        q = x @ params["wq"].T + params["bq"]
        k = x @ params["wk"].T
        v = x @ params["wv"].T + params["bv"]
        qh = q.reshape(B, S, head, hd).transpose(0, 2, 1, 3)
        kh = k.reshape(B, S, head, hd).transpose(0, 2, 1, 3)
        vh = v.reshape(B, S, head, hd).transpose(0, 2, 1, 3)
        qk = (qh * scale) @ jnp.swapaxes(kh * scale, -1, -2)
        fz = jnp.clip(jax.nn.softplus(params["fzero"]), params["min"], params["max"])
        token_ids = kh[:, :, :, 0]
        zscale = jnp.where(token_ids == 0.0, fz, 1.0)
        qk = qk * zscale[:, :, None, :]
        w = jax.nn.softmax(qk, axis=-1)
        wv = (w @ vh).transpose(0, 2, 1, 3).reshape(B, S, D)
        out = wv @ params["wo"].T + params["bo"]
        return out, qk


# ------------------------------ main ---------------------------------------- #

def _xavier_uniform(key, shape):
    fan_in, fan_out = shape[1], shape[0]
    a = (6.0 / (fan_in + fan_out)) ** 0.5
    return jax.random.uniform(key, shape, jnp.float32, minval=-a, maxval=a)


if __name__ == "__main__":
    # Small shapes consistent with MultiheadA: dims=32, head=4, batch=2, seq=8.
    B, S, D, H = 2, 8, 32, 4

    key = jax.random.PRNGKey(0)
    k_x, k_q, k_k, k_v, k_o = jax.random.split(key, 5)

    x = jax.random.normal(k_x, (B, S, D), jnp.float32)
    # Make one token an exact "pad" token: k has no bias, so an all-zero input row
    # gives k[..., 0] == 0.0 exactly and exercises the fzero/zscale path.
    x = x.at[0, 3, :].set(0.0)

    params = {
        "wq": _xavier_uniform(k_q, (D, D)), "bq": jnp.zeros((D,), jnp.float32),
        "wk": _xavier_uniform(k_k, (D, D)),
        "wv": _xavier_uniform(k_v, (D, D)), "bv": jnp.zeros((D,), jnp.float32),
        "wo": _xavier_uniform(k_o, (D, D)), "bo": jnp.zeros((D,), jnp.float32),
        "fzero": jnp.array(0.0001, jnp.float32),
        "min": 1e-6, "max": 1e-3,
    }

    out, qk = multihead_a_forward(x, params, H)
    out = jax.block_until_ready(out)
    qk = jax.block_until_ready(qk)

    out_ref, qk_ref = _ref_forward(x, params, H)
    assert out.shape == (B, S, D) and qk.shape == (B, H, S, S)
    assert jnp.allclose(qk, qk_ref, atol=2e-3, rtol=2e-3)
    assert jnp.allclose(out, out_ref, atol=5e-3, rtol=5e-3)

    # Hot path: no O(B*H*S^2) qk write-back.
    out2, _ = multihead_a_forward(x, params, H, return_qk=False)
    out2 = jax.block_until_ready(out2)
    assert jnp.allclose(out2, out_ref, atol=5e-3, rtol=5e-3)

    print("KERNEL_OK")
</pallas_src>

<mosaic_0001>
module attributes {stable_mosaic.version = 11 : i64} {
  func.func @_mha_kernel(%arg0: i32, %arg1: i32, %arg2: memref<1x8x32xf32, #tpu.memory_space<vmem>>, %arg3: memref<32x96xf32, #tpu.memory_space<vmem>>, %arg4: memref<1x96xf32, #tpu.memory_space<vmem>>, %arg5: memref<32x32xf32, #tpu.memory_space<vmem>>, %arg6: memref<1x32xf32, #tpu.memory_space<vmem>>, %arg7: memref<1x1xf32, #tpu.memory_space<smem>>, %arg8: memref<1x8x32xf32, #tpu.memory_space<vmem>>, %arg9: memref<1x1x8x8xf32, #tpu.memory_space<vmem>>, %arg10: memref<4x8x8xf32, #tpu.memory_space<vmem>>, %arg11: memref<4x8x8xf32, #tpu.memory_space<vmem>>, %arg12: memref<4x8x8xf32, #tpu.memory_space<vmem>>, %arg13: memref<4x8x8xf32, #tpu.memory_space<vmem>>) attributes {dimension_semantics = [#tpu.dimension_semantics<parallel>, #tpu.dimension_semantics<arbitrary>], iteration_bounds = array<i64: 2, 4>, scalar_prefetch = 0 : i64, scratch_operands = 4 : i64, tpu.core_type = #tpu.core_type<tc>, window_params = [{transform_indices = @transform_0, window_bounds = array<i64: 1, 8, 32>}, {pipeline_mode = #tpu.pipeline_mode<synchronous>, transform_indices = @transform_1, window_bounds = array<i64: 32, 96>}, {pipeline_mode = #tpu.pipeline_mode<synchronous>, transform_indices = @transform_2, window_bounds = array<i64: 1, 96>}, {pipeline_mode = #tpu.pipeline_mode<synchronous>, transform_indices = @transform_3, window_bounds = array<i64: 32, 32>}, {pipeline_mode = #tpu.pipeline_mode<synchronous>, transform_indices = @transform_4, window_bounds = array<i64: 1, 32>}, {transform_indices = @transform_5, window_bounds = array<i64: 1, 1>}, {transform_indices = @transform_6, window_bounds = array<i64: 1, 8, 32>}, {transform_indices = @transform_7, window_bounds = array<i64: 1, 1, 8, 8>}]} {
    %c0_i32 = arith.constant 0 : i32
    %0 = arith.cmpi eq, %arg1, %c0_i32 : i32
    %1 = arith.extui %0 : i1 to i32
    %c0_i32_0 = arith.constant 0 : i32
    %2 = arith.cmpi ne, %1, %c0_i32_0 : i32
    scf.if %2 {
      %c0_20 = arith.constant 0 : index
      %c0_21 = arith.constant 0 : index
      %c0_22 = arith.constant 0 : index
      %42 = vector.load %arg2[%c0_20, %c0_21, %c0_22] : memref<1x8x32xf32, #tpu.memory_space<vmem>>, vector<1x8x32xf32>
      %43 = vector.shape_cast %42 : vector<1x8x32xf32> to vector<8x32xf32>
      %c0_23 = arith.constant 0 : index
      %c0_24 = arith.constant 0 : index
      %44 = vector.load %arg3[%c0_23, %c0_24] : memref<32x96xf32, #tpu.memory_space<vmem>>, vector<32x96xf32>
      %cst_25 = arith.constant dense<0.000000e+00> : vector<8x96xf32>
      %45 = tpu.matmul %43, %44, %cst_25 {dimension_numbers = #tpu.dot_dimension_numbers<[1], [0], [0], [1], [0, 0, 1, 1], [], []>} : vector<8x32xf32>, vector<32x96xf32>, vector<8x96xf32> -> vector<8x96xf32>
      %c0_26 = arith.constant 0 : index
      %c0_27 = arith.constant 0 : index
      %46 = vector.load %arg4[%c0_26, %c0_27] : memref<1x96xf32, #tpu.memory_space<vmem>>, vector<1x96xf32>
      %47 = vector.broadcast %46 : vector<1x96xf32> to vector<8x96xf32>
      %48 = arith.addf %45, %47 : vector<8x96xf32>
      %49 = vector.extract_strided_slice %48 {offsets = [0, 0], sizes = [8, 8], strides = [1, 1]} : vector<8x96xf32> to vector<8x8xf32>
      %c0_28 = arith.constant 0 : index
      %c0_29 = arith.constant 0 : index
      %c0_30 = arith.constant 0 : index
      %50 = vector.load %arg10[%c0_28, %c0_29, %c0_30] : memref<4x8x8xf32, #tpu.memory_space<vmem>>, vector<1x8x8xf32>
      %51 = vector.shape_cast %50 : vector<1x8x8xf32> to vector<8x8xf32>
      %52 = vector.shape_cast %49 : vector<8x8xf32> to vector<1x8x8xf32>
      tpu.vector_store %arg10[%c0_28, %c0_29, %c0_30], %52 {strides = array<i32>} : memref<4x8x8xf32, #tpu.memory_space<vmem>>, vector<1x8x8xf32>,
      %53 = vector.extract_strided_slice %48 {offsets = [0, 32], sizes = [8, 8], strides = [1, 1]} : vector<8x96xf32> to vector<8x8xf32>
      %c0_31 = arith.constant 0 : index
      %c0_32 = arith.constant 0 : index
      %c0_33 = arith.constant 0 : index
      %54 = vector.load %arg11[%c0_31, %c0_32, %c0_33] : memref<4x8x8xf32, #tpu.memory_space<vmem>>, vector<1x8x8xf32>
      %55 = vector.shape_cast %54 : vector<1x8x8xf32> to vector<8x8xf32>
      %56 = vector.shape_cast %53 : vector<8x8xf32> to vector<1x8x8xf32>
      tpu.vector_store %arg11[%c0_31, %c0_32, %c0_33], %56 {strides = array<i32>} : memref<4x8x8xf32, #tpu.memory_space<vmem>>, vector<1x8x8xf32>,
      %57 = vector.extract_strided_slice %48 {offsets = [0, 64], sizes = [8, 8], strides = [1, 1]} : vector<8x96xf32> to vector<8x8xf32>
      %c0_34 = arith.constant 0 : index
      %c0_35 = arith.constant 0 : index
      %c0_36 = arith.constant 0 : index
      %58 = vector.load %arg12[%c0_34, %c0_35, %c0_36] : memref<4x8x8xf32, #tpu.memory_space<vmem>>, vector<1x8x8xf32>
      %59 = vector.shape_cast %58 : vector<1x8x8xf32> to vector<8x8xf32>
      %60 = vector.shape_cast %57 : vector<8x8xf32> to vector<1x8x8xf32>
      tpu.vector_store %arg12[%c0_34, %c0_35, %c0_36], %60 {strides = array<i32>} : memref<4x8x8xf32, #tpu.memory_space<vmem>>, vector<1x8x8xf32>,
      %61 = vector.extract_strided_slice %48 {offsets = [0, 8], sizes = [8, 8], strides = [1, 1]} : vector<8x96xf32> to vector<8x8xf32>
      %c1 = arith.constant 1 : index
      %c0_37 = arith.constant 0 : index
      %c0_38 = arith.constant 0 : index
      %62 = vector.load %arg10[%c1, %c0_37, %c0_38] : memref<4x8x8xf32, #tpu.memory_space<vmem>>, vector<1x8x8xf32>
      %63 = vector.shape_cast %62 : vector<1x8x8xf32> to vector<8x8xf32>
      %64 = vector.shape_cast %61 : vector<8x8xf32> to vector<1x8x8xf32>
      tpu.vector_store %arg10[%c1, %c0_37, %c0_38], %64 {strides = array<i32>} : memref<4x8x8xf32, #tpu.memory_space<vmem>>, vector<1x8x8xf32>,
      %65 = vector.extract_strided_slice %48 {offsets = [0, 40], sizes = [8, 8], strides = [1, 1]} : vector<8x96xf32> to vector<8x8xf32>
      %c1_39 = arith.constant 1 : index
      %c0_40 = arith.constant 0 : index
      %c0_41 = arith.constant 0 : index
      %66 = vector.load %arg11[%c1_39, %c0_40, %c0_41] : memref<4x8x8xf32, #tpu.memory_space<vmem>>, vector<1x8x8xf32>
      %67 = vector.shape_cast %66 : vector<1x8x8xf32> to vector<8x8xf32>
      %68 = vector.shape_cast %65 : vector<8x8xf32> to vector<1x8x8xf32>
      tpu.vector_store %arg11[%c1_39, %c0_40, %c0_41], %68 {strides = array<i32>} : memref<4x8x8xf32, #tpu.memory_space<vmem>>, vector<1x8x8xf32>,
      %69 = vector.extract_strided_slice %48 {offsets = [0, 72], sizes = [8, 8], strides = [1, 1]} : vector<8x96xf32> to vector<8x8xf32>
      %c1_42 = arith.constant 1 : index
      %c0_43 = arith.constant 0 : index
      %c0_44 = arith.constant 0 : index
      %70 = vector.load %arg12[%c1_42, %c0_43, %c0_44] : memref<4x8x8xf32, #tpu.memory_space<vmem>>, vector<1x8x8xf32>
      %71 = vector.shape_cast %70 : vector<1x8x8xf32> to vector<8x8xf32>
      %72 = vector.shape_cast %69 : vector<8x8xf32> to vector<1x8x8xf32>
      tpu.vector_store %arg12[%c1_42, %c0_43, %c0_44], %72 {strides = array<i32>} : memref<4x8x8xf32, #tpu.memory_space<vmem>>, vector<1x8x8xf32>,
      %73 = vector.extract_strided_slice %48 {offsets = [0, 16], sizes = [8, 8], strides = [1, 1]} : vector<8x96xf32> to vector<8x8xf32>
      %c2 = arith.constant 2 : index
      %c0_45 = arith.constant 0 : index
      %c0_46 = arith.constant 0 : index
      %74 = vector.load %arg10[%c2, %c0_45, %c0_46] : memref<4x8x8xf32, #tpu.memory_space<vmem>>, vector<1x8x8xf32>
      %75 = vector.shape_cast %74 : vector<1x8x8xf32> to vector<8x8xf32>
      %76 = vector.shape_cast %73 : vector<8x8xf32> to vector<1x8x8xf32>
      tpu.vector_store %arg10[%c2, %c0_45, %c0_46], %76 {strides = array<i32>} : memref<4x8x8xf32, #tpu.memory_space<vmem>>, vector<1x8x8xf32>,
      %77 = vector.extract_strided_slice %48 {offsets = [0, 48], sizes = [8, 8], strides = [1, 1]} : vector<8x96xf32> to vector<8x8xf32>
      %c2_47 = arith.constant 2 : index
      %c0_48 = arith.constant 0 : index
      %c0_49 = arith.constant 0 : index
      %78 = vector.load %arg11[%c2_47, %c0_48, %c0_49] : memref<4x8x8xf32, #tpu.memory_space<vmem>>, vector<1x8x8xf32>
      %79 = vector.shape_cast %78 : vector<1x8x8xf32> to vector<8x8xf32>
      %80 = vector.shape_cast %77 : vector<8x8xf32> to vector<1x8x8xf32>
      tpu.vector_store %arg11[%c2_47, %c0_48, %c0_49], %80 {strides = array<i32>} : memref<4x8x8xf32, #tpu.memory_space<vmem>>, vector<1x8x8xf32>,
      %81 = vector.extract_strided_slice %48 {offsets = [0, 80], sizes = [8, 8], strides = [1, 1]} : vector<8x96xf32> to vector<8x8xf32>
      %c2_50 = arith.constant 2 : index
      %c0_51 = arith.constant 0 : index
      %c0_52 = arith.constant 0 : index
      %82 = vector.load %arg12[%c2_50, %c0_51, %c0_52] : memref<4x8x8xf32, #tpu.memory_space<vmem>>, vector<1x8x8xf32>
      %83 = vector.shape_cast %82 : vector<1x8x8xf32> to vector<8x8xf32>
      %84 = vector.shape_cast %81 : vector<8x8xf32> to vector<1x8x8xf32>
      tpu.vector_store %arg12[%c2_50, %c0_51, %c0_52], %84 {strides = array<i32>} : memref<4x8x8xf32, #tpu.memory_space<vmem>>, vector<1x8x8xf32>,
      %85 = vector.extract_strided_slice %48 {offsets = [0, 24], sizes = [8, 8], strides = [1, 1]} : vector<8x96xf32> to vector<8x8xf32>
      %c3 = arith.constant 3 : index
      %c0_53 = arith.constant 0 : index
      %c0_54 = arith.constant 0 : index
      %86 = vector.load %arg10[%c3, %c0_53, %c0_54] : memref<4x8x8xf32, #tpu.memory_space<vmem>>, vector<1x8x8xf32>
      %87 = vector.shape_cast %86 : vector<1x8x8xf32> to vector<8x8xf32>
      %88 = vector.shape_cast %85 : vector<8x8xf32> to vector<1x8x8xf32>
      tpu.vector_store %arg10[%c3, %c0_53, %c0_54], %88 {strides = array<i32>} : memref<4x8x8xf32, #tpu.memory_space<vmem>>, vector<1x8x8xf32>,
      %89 = vector.extract_strided_slice %48 {offsets = [0, 56], sizes = [8, 8], strides = [1, 1]} : vector<8x96xf32> to vector<8x8xf32>
      %c3_55 = arith.constant 3 : index
      %c0_56 = arith.constant 0 : index
      %c0_57 = arith.constant 0 : index
      %90 = vector.load %arg11[%c3_55, %c0_56, %c0_57] : memref<4x8x8xf32, #tpu.memory_space<vmem>>, vector<1x8x8xf32>
      %91 = vector.shape_cast %90 : vector<1x8x8xf32> to vector<8x8xf32>
      %92 = vector.shape_cast %89 : vector<8x8xf32> to vector<1x8x8xf32>
      tpu.vector_store %arg11[%c3_55, %c0_56, %c0_57], %92 {strides = array<i32>} : memref<4x8x8xf32, #tpu.memory_space<vmem>>, vector<1x8x8xf32>,
      %93 = vector.extract_strided_slice %48 {offsets = [0, 88], sizes = [8, 8], strides = [1, 1]} : vector<8x96xf32> to vector<8x8xf32>
      %c3_58 = arith.constant 3 : index
      %c0_59 = arith.constant 0 : index
      %c0_60 = arith.constant 0 : index
      %94 = vector.load %arg12[%c3_58, %c0_59, %c0_60] : memref<4x8x8xf32, #tpu.memory_space<vmem>>, vector<1x8x8xf32>
      %95 = vector.shape_cast %94 : vector<1x8x8xf32> to vector<8x8xf32>
      %96 = vector.shape_cast %93 : vector<8x8xf32> to vector<1x8x8xf32>
      tpu.vector_store %arg12[%c3_58, %c0_59, %c0_60], %96 {strides = array<i32>} : memref<4x8x8xf32, #tpu.memory_space<vmem>>, vector<1x8x8xf32>,
    } else {
    }
    %3 = arith.index_cast %arg1 : i32 to index
    %c0 = arith.constant 0 : index
    %c0_1 = arith.constant 0 : index
    %4 = vector.load %arg10[%3, %c0, %c0_1] : memref<4x8x8xf32, #tpu.memory_space<vmem>>, vector<1x8x8xf32>
    %5 = vector.shape_cast %4 : vector<1x8x8xf32> to vector<8x8xf32>
    %6 = arith.index_cast %arg1 : i32 to index
    %c0_2 = arith.constant 0 : index
    %c0_3 = arith.constant 0 : index
    %7 = vector.load %arg11[%6, %c0_2, %c0_3] : memref<4x8x8xf32, #tpu.memory_space<vmem>>, vector<1x8x8xf32>
    %8 = vector.shape_cast %7 : vector<1x8x8xf32> to vector<8x8xf32>
    %9 = arith.index_cast %arg1 : i32 to index
    %c0_4 = arith.constant 0 : index
    %c0_5 = arith.constant 0 : index
    %10 = vector.load %arg12[%9, %c0_4, %c0_5] : memref<4x8x8xf32, #tpu.memory_space<vmem>>, vector<1x8x8xf32>
    %11 = vector.shape_cast %10 : vector<1x8x8xf32> to vector<8x8xf32>
    %c0_6 = arith.constant 0 : index
    %c0_7 = arith.constant 0 : index
    %12 = memref.load %arg7[%c0_6, %c0_7] : memref<1x1xf32, #tpu.memory_space<smem>>
    %13 = vector.extract_strided_slice %8 {offsets = [0, 0], sizes = [8, 1], strides = [1, 1]} : vector<8x8xf32> to vector<8x1xf32>
    %cst = arith.constant 0.000000e+00 : f32
    %14 = vector.broadcast %cst : f32 to vector<8x1xf32>
    %15 = arith.cmpf oeq, %13, %14 : vector<8x1xf32>
    %cst_8 = arith.constant 1.000000e+00 : f32
    %16 = vector.broadcast %12 : f32 to vector<8x1xf32>
    %17 = vector.broadcast %cst_8 : f32 to vector<8x1xf32>
    %18 = arith.select %15, %16, %17 : vector<8x1xi1>, vector<8x1xf32>
    %19 = vector.broadcast %18 : vector<8x1xf32> to vector<8x8xf32>
    %20 = arith.mulf %8, %19 : vector<8x8xf32>
    %cst_9 = arith.constant dense<0.000000e+00> : vector<8x8xf32>
    %21 = tpu.matmul %5, %20, %cst_9 {dimension_numbers = #tpu.dot_dimension_numbers<[1], [1], [0], [0], [0, 0, 1, 0], [], []>} : vector<8x8xf32>, vector<8x8xf32>, vector<8x8xf32> -> vector<8x8xf32>
    %c0_10 = arith.constant 0 : index
    %c0_11 = arith.constant 0 : index
    %c0_12 = arith.constant 0 : index
    %c0_13 = arith.constant 0 : index
    %22 = vector.load %arg9[%c0_10, %c0_11, %c0_12, %c0_13] : memref<1x1x8x8xf32, #tpu.memory_space<vmem>>, vector<1x1x8x8xf32>
    %23 = vector.shape_cast %22 : vector<1x1x8x8xf32> to vector<8x8xf32>
    %24 = vector.shape_cast %21 : vector<8x8xf32> to vector<1x1x8x8xf32>
    tpu.vector_store %arg9[%c0_10, %c0_11, %c0_12, %c0_13], %24 {strides = array<i32>} : memref<1x1x8x8xf32, #tpu.memory_space<vmem>>, vector<1x1x8x8xf32>,
    %cst_14 = arith.constant dense<0xFF800000> : vector<8xf32>
    %25 = vector.multi_reduction <maximumf>, %21, %cst_14 [1] : vector<8x8xf32> to vector<8xf32>
    %26 = vector.shape_cast %25 : vector<8xf32> to vector<8x1xf32>
    %27 = vector.broadcast %26 : vector<8x1xf32> to vector<8x8xf32>
    %28 = arith.subf %21, %27 : vector<8x8xf32>
    %29 = math.exp %28 : vector<8x8xf32>
    %cst_15 = arith.constant dense<0.000000e+00> : vector<8xf32>
    %30 = vector.multi_reduction <add>, %29, %cst_15 [1] : vector<8x8xf32> to vector<8xf32>
    %31 = vector.shape_cast %30 : vector<8xf32> to vector<8x1xf32>
    %32 = vector.broadcast %31 : vector<8x1xf32> to vector<8x8xf32>
    %33 = arith.divf %29, %32 : vector<8x8xf32>
    %cst_16 = arith.constant dense<0.000000e+00> : vector<8x8xf32>
    %34 = tpu.matmul %33, %11, %cst_16 {dimension_numbers = #tpu.dot_dimension_numbers<[1], [0], [0], [1], [0, 0, 1, 1], [], []>} : vector<8x8xf32>, vector<8x8xf32>, vector<8x8xf32> -> vector<8x8xf32>
    %35 = arith.index_cast %arg1 : i32 to index
    %c0_17 = arith.constant 0 : index
    %c0_18 = arith.constant 0 : index
    %36 = vector.load %arg13[%35, %c0_17, %c0_18] : memref<4x8x8xf32, #tpu.memory_space<vmem>>, vector<1x8x8xf32>
    %37 = vector.shape_cast %36 : vector<1x8x8xf32> to vector<8x8xf32>
    %38 = vector.shape_cast %34 : vector<8x8xf32> to vector<1x8x8xf32>
    tpu.vector_store %arg13[%35, %c0_17, %c0_18], %38 {strides = array<i32>} : memref<4x8x8xf32, #tpu.memory_space<vmem>>, vector<1x8x8xf32>,
    %c3_i32 = arith.constant 3 : i32
    %39 = arith.cmpi eq, %arg1, %c3_i32 : i32
    %40 = arith.extui %39 : i1 to i32
    %c0_i32_19 = arith.constant 0 : i32
    %41 = arith.cmpi ne, %40, %c0_i32_19 : i32
    scf.if %41 {
      %c0_20 = arith.constant 0 : index
      %c0_21 = arith.constant 0 : index
      %c0_22 = arith.constant 0 : index
      %42 = vector.load %arg13[%c0_20, %c0_21, %c0_22] : memref<4x8x8xf32, #tpu.memory_space<vmem>>, vector<1x8x8xf32>
      %43 = vector.shape_cast %42 : vector<1x8x8xf32> to vector<8x8xf32>
      %c1 = arith.constant 1 : index
      %c0_23 = arith.constant 0 : index
      %c0_24 = arith.constant 0 : index
      %44 = vector.load %arg13[%c1, %c0_23, %c0_24] : memref<4x8x8xf32, #tpu.memory_space<vmem>>, vector<1x8x8xf32>
      %45 = vector.shape_cast %44 : vector<1x8x8xf32> to vector<8x8xf32>
      %c2 = arith.constant 2 : index
      %c0_25 = arith.constant 0 : index
      %c0_26 = arith.constant 0 : index
      %46 = vector.load %arg13[%c2, %c0_25, %c0_26] : memref<4x8x8xf32, #tpu.memory_space<vmem>>, vector<1x8x8xf32>
      %47 = vector.shape_cast %46 : vector<1x8x8xf32> to vector<8x8xf32>
      %c3 = arith.constant 3 : index
      %c0_27 = arith.constant 0 : index
      %c0_28 = arith.constant 0 : index
      %48 = vector.load %arg13[%c3, %c0_27, %c0_28] : memref<4x8x8xf32, #tpu.memory_space<vmem>>, vector<1x8x8xf32>
      %49 = vector.shape_cast %48 : vector<1x8x8xf32> to vector<8x8xf32>
      %50 = tpu.concatenate %43, %45, %47, %49 in 1 : vector<8x8xf32>, vector<8x8xf32>, vector<8x8xf32>, vector<8x8xf32> -> vector<8x32xf32>
      %c0_29 = arith.constant 0 : index
      %c0_30 = arith.constant 0 : index
      %51 = vector.load %arg5[%c0_29, %c0_30] : memref<32x32xf32, #tpu.memory_space<vmem>>, vector<32x32xf32>
      %cst_31 = arith.constant dense<0.000000e+00> : vector<8x32xf32>
      %52 = tpu.matmul %50, %51, %cst_31 {dimension_numbers = #tpu.dot_dimension_numbers<[1], [0], [0], [1], [0, 0, 1, 1], [], []>} : vector<8x32xf32>, vector<32x32xf32>, vector<8x32xf32> -> vector<8x32xf32>
      %c0_32 = arith.constant 0 : index
      %c0_33 = arith.constant 0 : index
      %53 = vector.load %arg6[%c0_32, %c0_33] : memref<1x32xf32, #tpu.memory_space<vmem>>, vector<1x32xf32>
      %54 = vector.broadcast %53 : vector<1x32xf32> to vector<8x32xf32>
      %55 = arith.addf %52, %54 : vector<8x32xf32>
      %c0_34 = arith.constant 0 : index
      %c0_35 = arith.constant 0 : index
      %c0_36 = arith.constant 0 : index
      %56 = vector.load %arg8[%c0_34, %c0_35, %c0_36] : memref<1x8x32xf32, #tpu.memory_space<vmem>>, vector<1x8x32xf32>
      %57 = vector.shape_cast %56 : vector<1x8x32xf32> to vector<8x32xf32>
      %58 = vector.shape_cast %55 : vector<8x32xf32> to vector<1x8x32xf32>
      tpu.vector_store %arg8[%c0_34, %c0_35, %c0_36], %58 {strides = array<i32>} : memref<1x8x32xf32, #tpu.memory_space<vmem>>, vector<1x8x32xf32>,
    } else {
    }
    return
  }
  func.func @transform_0(%arg0: i32, %arg1: i32) -> (i32, i32, i32) {
    %c0_i32 = arith.constant 0 : i32
    %c0_i32_0 = arith.constant 0 : i32
    %c0_i32_1 = arith.constant 0 : i32
    return %arg0, %c0_i32, %c0_i32_0 : i32, i32, i32
  }
  func.func @transform_1(%arg0: i32, %arg1: i32) -> (i32, i32) {
    %c0_i32 = arith.constant 0 : i32
    %c0_i32_0 = arith.constant 0 : i32
    %c0_i32_1 = arith.constant 0 : i32
    return %c0_i32, %c0_i32_0 : i32, i32
  }
  func.func @transform_2(%arg0: i32, %arg1: i32) -> (i32, i32) {
    %c0_i32 = arith.constant 0 : i32
    %c0_i32_0 = arith.constant 0 : i32
    %c0_i32_1 = arith.constant 0 : i32
    return %c0_i32, %c0_i32_0 : i32, i32
  }
  func.func @transform_3(%arg0: i32, %arg1: i32) -> (i32, i32) {
    %c0_i32 = arith.constant 0 : i32
    %c0_i32_0 = arith.constant 0 : i32
    %c0_i32_1 = arith.constant 0 : i32
    return %c0_i32, %c0_i32_0 : i32, i32
  }
  func.func @transform_4(%arg0: i32, %arg1: i32) -> (i32, i32) {
    %c0_i32 = arith.constant 0 : i32
    %c0_i32_0 = arith.constant 0 : i32
    %c0_i32_1 = arith.constant 0 : i32
    return %c0_i32, %c0_i32_0 : i32, i32
  }
  func.func @transform_5(%arg0: i32, %arg1: i32) -> (i32, i32) {
    %c0_i32 = arith.constant 0 : i32
    %c0_i32_0 = arith.constant 0 : i32
    %c0_i32_1 = arith.constant 0 : i32
    return %c0_i32, %c0_i32_0 : i32, i32
  }
  func.func @transform_6(%arg0: i32, %arg1: i32) -> (i32, i32, i32) {
    %c0_i32 = arith.constant 0 : i32
    %c0_i32_0 = arith.constant 0 : i32
    %c0_i32_1 = arith.constant 0 : i32
    return %arg0, %c0_i32, %c0_i32_0 : i32, i32, i32
  }
  func.func @transform_7(%arg0: i32, %arg1: i32) -> (i32, i32, i32, i32) {
    %c0_i32 = arith.constant 0 : i32
    %c0_i32_0 = arith.constant 0 : i32
    %c0_i32_1 = arith.constant 0 : i32
    return %arg0, %arg1, %c0_i32, %c0_i32_0 : i32, i32, i32, i32
  }
}

</mosaic_0001>

<bundles_post_ra>
// kernel: tpu_custom_call.1
= control target key start
LH: loop header
LB: loop body
LE: loop exit
PB: predicated region body
PF: predicated region fallthrough
CT: control target
= control target key end

     0   :  { %s1579_s0 = inlined_call_operand.hbm [shape: f32[2,8,32], index: 0, kind: input, shape index: {}]   ;;  %s1580_s1 = inlined_call_operand.hbm [shape: f32[32,96], index: 1, kind: input, shape index: {}]   ;;  %s1581_s2 = inlined_call_operand.vmem [shape: f32[1,96], index: 2, kind: input, shape index: {}]   ;;  %s1582_s3 = inlined_call_operand.hbm [shape: f32[32,32], index: 3, kind: input, shape index: {}]   ;;  %s1583_s4 = inlined_call_operand.vmem [shape: f32[1,32], index: 4, kind: input, shape index: {}]   ;;  %s1584_s5 = inlined_call_operand.<no memory space> [shape: f32[1,1], index: 5, kind: input, shape index: {}]   ;;  %s1585_s6 = inlined_call_operand.hbm [shape: f32[2,8,32], index: 6, kind: output, shape index: {0}]   ;;  %s1586_s7 = inlined_call_operand.hbm [shape: f32[2,4,8,8], index: 7, kind: output, shape index: {1}]  }
   0x1   :  { %1597 = sst [smem:[#allocation28_spill]] %s1579_s0 }
   0x2   :  { %1598 = sst [smem:[#allocation29_spill]] %s1580_s1 }
   0x3   :  { %1599 = sst [smem:[#allocation30_spill]] %s1581_s2 }
   0x4   :  { %1600 = sst [smem:[#allocation31_spill]] %s1582_s3 }
   0x5   :  { %13 = sst [smem:[#allocation6]] %s1584_s5 }
   0x6   :  { %14 = vsyncpa [#allocation8], 0 }
   0x7   :  { %16 = vsyncpa [#allocation8 + $0x1], 0 }
   0x8   :  { %17 = vsyncpa [#allocation11], 0 }
   0x9   :  { %18 = vsyncpa [#allocation9], 0 }
   0xa   :  { %20 = vsyncpa [#allocation9 + $0x1], 0 }
   0xb   :  { %21 = vsyncpa [#allocation15], 0 }
   0xc   :  { %23 = vsyncpa [#allocation15 + $0x1], 0  ;;  %s1276_s26 = smov 0   ;;  %s1278_s27 = smov 0  }
   0xd   :  { %s1280_s28 = smov 0   ;;  %s1282_s29 = smov 0  }
   0xe   :  { %s1284_s30 = smov 0   ;;  %s1286_s8 = smov 0  }
   0xf   :  { %s1288_s5 = smov 0   ;;  %s1290_s9 = smov 0  }
  0x10   :  { %s1292_s10 = smov 0   ;;  %s1294_s11 = smov 0  }
  0x11   :  { %s1296_s12 = smov 0  }
  0x12 LB: > { %1601 = sst [smem:[#allocation20_spill]] %s1172_s26  ;;  %s1587_s13 = sadd.s32 4294967295, %s1212_s12   ;;  %s1212_s12 = sphi %s1296_s12, %s29_s12   ;;  %s1208_s11 = sphi %s1294_s11, %s1634_s11   ;;  %s1204_s10 = sphi %s1292_s10, %s1633_s10   ;;  %s1200_s9 = sphi %s1290_s9, %s1632_s9   ;;  %s1196_s5 = sphi %s1288_s5, %s1631_s5   ;;  %s1192_s8 = sphi %s1286_s8, %s1640_s8   ;;  %s1188_s30 = sphi %s1284_s30, %s1639_s30   ;;  %s1184_s29 = sphi %s1282_s29, %s1638_s29   ;;  %s1180_s28 = sphi %s1280_s28, %s1637_s28   ;;  %s1176_s27 = sphi %s1278_s27, %s1636_s27   ;;  %s1172_s26 = sphi %s1276_s26, %s1635_s26  }
  0x13   : > { %1602 = sst [smem:[#allocation21_spill]] %s1184_s29  ;;  %p785_p0 = scmp.ge.s32.totalorder %s1212_s12, 1 }
  0x14   : > { %1603 = sst [smem:[#allocation22_spill]] %s1204_s10  ;;  %p1335_p1 = scmp.eq.s32.totalorder %s1587_s13, 0 }
  0x15   : > { %1604 = sst [smem:[#allocation23_spill]] %s1208_s11  ;;  %p231_p2 = scmp.lt.s32.totalorder %s1212_s12, 9 }
  0x16   : > { %s1606_s1 = sld [smem:[#allocation29_spill]]  ;;  %s1214_s19 = smov [#allocation10]  }
  0x17   : > { %p1343_p3 = pnand %p785_p0, %p231_p2  ;;  %s244_s20 = sshll.u32 %s1214_s19, 4  ;;  %s245_s20 = int_to_ptr.vmem [resolvable:$true] %s244_s20 }
  0x18   : > { %s1608_s3 = sld [smem:[#allocation31_spill]]  ;;  %s1215_s24 = smov 128  }
  0x19   : > { %p826_p4 = pneg %p1343_p3  ;;  %s1216_s25 = smov 8  }
  0x1a   : > { %s1217_s15 = smov [#allocation12]   ;;  %s38_s19 = sadd.s32 1, %s1204_s10 }
  0x1b   : > { %p827_p5 = pnand %p826_p4, %p1335_p1  ;;  %s261_s16 = sshll.u32 %s1217_s15, 4  ;;  %s262_s16 = int_to_ptr.vmem [resolvable:$true] %s261_s16 }
  0x1c   : > { %s242_s17 = sshll.u32 %s1606_s1, 4  ;;  %p39_p6 = scmp.ge.s32.totalorder %s38_s19, 4  ;;  %s243_s17 = int_to_ptr.hbm [resolvable:$true] %s242_s17 }
  0x1d   : > { %829 = dma.hbm_to_vmem [thread:$0]  (!%p827_p5), %s243_s17, 512, %s245_s20, [#allocation11], %s1215_s24, %s1215_s24, %s1216_s25  }
  0x1e   : > { %s259_s23 = sshll.u32 %s1608_s3, 4  ;;  %s41_s21 = sadd.s32 1, %s1208_s11  ;;  %s260_s23 = int_to_ptr.hbm [resolvable:$true] %s259_s23 }
  0x1f   : > { %832 = dma.hbm_to_vmem [thread:$0]  (!%p827_p5), %s260_s23, 512, %s262_s16, [#allocation11], %s1215_s24, %s1215_s24, %s1216_s25  }
  0x20   : > { %s784_s22 = sadd.s32 4294967294, %s1212_s12   ;;  %s48_s13 = sadd.s32 1, %s1192_s8 }
  0x21   : > { %s1642_s19 = smov (%p39_p6, %s38_s19), 0  ;;  %s1644_s21 = smov (!%p39_p6, %s41_s21), %s1208_s11 }
  0x22   : > { %1609 = sst [smem:[#allocation24_spill]] %s1642_s19  ;;  %p55_p7 = scmp.ne.s32.totalorder %s1192_s8, %s1188_s30 }
  0x23   : > { %p61_p8 = scmp.ne.s32.totalorder %s1188_s30, %s1184_s29  ;;  %p43_p9 = scmp.ge.s32.totalorder %s1644_s21, 2 }
  0x24   : > { %s1610_s17 = sadd.s32 4294967295, %s1212_s12   ;;  %p56_p11 = scmp.eq.s32.totalorder %s1212_s12, 0 }
  0x25   : > { %p1367_p10 = scmp.eq.s32.totalorder %s1610_s17, 7  ;;  %p1374_p12 = por %p1335_p1, %p61_p8 }
  0x26   : > { %s1646_s21 = smov (%p43_p9, %s1644_s21), 0  ;;  %p1389_p0 = scmp.eq.s32.totalorder %s784_s22, 7 }
  0x27   : > { %1613 = sst [smem:[#allocation25_spill]] %s1646_s21  ;;  %p1385_p13 = por %p1367_p10, %p55_p7 }
  0x28   : > { %s45_s15 = ssub.s32 %s1208_s11, %s1646_s21  ;;  %s203_s16 = ssub.s32 %s1204_s10, %s1642_s19 }
  0x29   : > { %s1614_s24 = scalar_select %p1385_p13, 1, 0 }
  0x2a   : > { %p46_p2 = scmp.eq.s32.totalorder %s45_s15, 0  ;;  %p1399_p4 = por %p1389_p0, %p61_p8 }
  0x2b   : > { %s204_s1 = sor.u32 %s203_s16, %s45_s15  ;;  %s207_s3 = sadd.s32 1, %s1180_s28 }
  0x2c   : > { %s1405_s29 = scalar_select %p46_p2, %s1192_s8, %s48_s13  }
  0x2d   : > { %p205_p5 = scmp.eq.s32.totalorder %s204_s1, 0  ;;  %p217_p6 = scmp.ne.s32.totalorder %s1180_s28, %s1176_s27 }
  0x2e   : > { %1617 = sst [smem:[#allocation26_spill]] %s1405_s29  ;;  %p1414_p9 = por %p56_p11, %p55_p7 }
  0x2f   : > { %p223_p13 = scmp.ne.s32.totalorder %s1176_s27, %s1172_s26  ;;  %p1425_p8 = por %p217_p6, %p1367_p10 }
  0x30   : > { %s1421_s21 = scalar_select %p205_p5, %s1180_s28, %s207_s3  }
  0x31   : > { %p1431_p2 = por %p223_p13, %p1389_p0  ;;  %s281_s1 = sand.u32 1, %s1192_s8  }
  0x32   : > { %1619 = sst [smem:[#allocation27_spill]] %s1421_s21  ;;  %s790_s15 = sshll.u32 %s1208_s11, 3 }
  0x33   : > { %p846_p7 = scmp.lt.s32.totalorder %s1212_s12, 8  ;;  %s789_s16 = sshll.u32 %s281_s1, 3 }
  0x34   : > { %s1622_s0 = sld [smem:[#allocation28_spill]]  ;;  %s285_s21 = scalar_lea.vmem [#allocation7], %s789_s16 }
  0x35   : > { %s293_s20 = sshll.u32 %s285_s21, 4  ;;  %p834_p10 = pnand %p846_p7, %p1414_p9  ;;  %s294_s20 = int_to_ptr.vmem [resolvable:$true] %s293_s20 }
  0x36   : > { %s282_s25 = scalar_lea.sflag [#allocation8], %s281_s1  ;;  %s1446_s11 = sand.u32 (!%p1343_p3), 1, %s1188_s30  }
  0x37   : > { %s792_s29 = sshll.u32 (!%p1343_p3), %s1446_s11, 3  ;;  %s305_s10 = scalar_lea.sflag (!%p1343_p3), [#allocation8], %s1446_s11 }
  0x38   : > { %302 = sbr.rel (%p1343_p3) target bundleno = 1288 (0x508), region = 44 }
  0x3a   : > { %s289_s26 = scalar_lea.hbm %s1622_s0, %s790_s15 }
  0x3b   : > { %s291_s3 = sshll.u32 %s289_s26, 4  ;;  %s308_s26 = scalar_lea.vmem (!%p1343_p3), [#allocation7], %s792_s29  ;;  %s292_s3 = int_to_ptr.hbm [resolvable:$true] %s291_s3 }
  0x3c   : > { %836 = dma.hbm_to_vmem [thread:$0]  (!%p834_p10), %s292_s3, 128, %s294_s20, %s282_s25  }
  0x3d   : > { %1155 = dma.done.wait (%p1374_p12), %s305_s10, 128  }
  0x3e   : > { %1157 = vsyncadd (%p1374_p12), %s305_s10, 4294967168 }
  0x3f   : > { %1159 = dma.done.wait (%p1335_p1), [#allocation11], 1024  }
  0x40   : > { %1161 = vsyncadd (%p1335_p1), [#allocation11], 4294966272  ;;  %s1595_s18 = sand.u32 1, %s1176_s27   ;;  %s1463_s22 = scalar_lea.vmem [#allocation13], %s792_s29 }
  0x41   : > { %s1461_s21 = sshll.u32 %s1595_s18, 3  ;;  %p797_p3 = scmp.ne.s32.totalorder %s1196_s5, 0 }
  0x42   : > { %s1596_s1 = scalar_lea.vmem [#allocation14], %s1461_s21  ;;  %s1623_s2 = sld [smem:[#allocation30_spill]] (!%p797_p3) }
  0x43   : > { %358 = sbr.rel (%p797_p3) target bundleno = 349 (0x15d), region = 60  ;;  %s1218_s15 = smov (!%p797_p3), 56  }
  0x44   : > { %s1219_s16 = smov (!%p797_p3), 120   ;;  %s1220_s3 = smov (!%p797_p3), 96  }
  0x45   : > { %s1221_s20 = smov (!%p797_p3), 112   ;;  %s1222_s25 = smov (!%p797_p3), 88  }
  0x46   : > { %s1223_s29 = smov (!%p797_p3), 64   ;;  %s1224_s10 = smov (!%p797_p3), 104  }
  0x47   : > { %s1226_s14 = smov (!%p797_p3), 80   ;;  %s1227_s23 = smov (!%p797_p3), 40  }
  0x48   : > { %v363_v0 = vld [vmem:[#allocation10 + $0x18] sm:$0xff]  ;;  %v362_v1 = vld [vmem:[#allocation10 + $0x10] sm:$0xff]  ;;  %v361_v2 = vld [vmem:[#allocation10 + $0x8] sm:$0xff]  ;;  %vm368_vm0 = vcmask 261120   ;;  %vm392_vm1 = vcmask 64512  }
  0x49   : > { %384 = vmatpush.msra.mxu0 %v363_v0  ;;  %v360_v3 = vld [vmem:[#allocation10] sm:$0xff]  ;;  %v359_v4 = vld [vmem:[%s308_s26] sm:$0xff]  ;;  %s1225_s26 = smov 48  }
  0x4a   : > { %v957_v5 = vld [vmem:[%s1623_s2] ss:$0 sm:$0xff] }
  0x4b   : > { %385 = vmatpush.msra.mxu0 %v362_v1 }
  0x4d   : > { %386 = vmatpush.msra.mxu0 %v361_v2 }
  0x4f   : > { %387 = vmatpush.msra.mxu0 %v360_v3 }
  0x50   : > { %798 = vmatmul.msk.f32.vlgmr.msra.gmra.mxu0 %vm368_vm0, %v359_v4 }
  0xcd   : > { %v389_v6 = vpop.f32.mrf.mxu0 }
  0xce   : > { %v390_v7 = vadd.f32 %v957_v5, %v389_v6 }
  0xd0   : > { %413 = vrot.lane.b32.xlu2 %v390_v7, %s1218_s15  ;;  %403 = vrot.lane.b32.xlu1 %v390_v7, %s1219_s16  ;;  %393 = vst.msk [vmem:[#allocation2] sm:$0xff] %vm392_vm1, %v390_v7  ;;  %s1228_s15 = smov 72  }
  0xd1   : > { %395 = vrot.lane.b32.xlu0 %v390_v7, %s1220_s3 }
  0xd8   : > { %418 = vrot.lane.b32.xlu2 %v390_v7, %s1221_s20  ;;  %408 = vrot.lane.b32.xlu1 %v390_v7, %s1222_s25 }
  0xd9   : > { %399 = vrot.lane.b32.xlu0 %v390_v7, %s1223_s29 }
  0xe0   : > { %433 = vrot.lane.b32.xlu2 %v390_v7, %s1224_s10  ;;  %428 = vrot.lane.b32.xlu1 %v390_v7, %s1225_s26 }
  0xe1   : > { %423 = vrot.lane.b32.xlu0 %v390_v7, %s1226_s14 }
  0xe8   : > { %443 = vrot.lane.b32.xlu1 %v390_v7, %s1227_s23 }
  0xe9   : > { %438 = vrot.lane.b32.xlu0 %v390_v7, %s1228_s15 }
 0x12a   : > { %v414_v8 = vpop.permute.xlu2 %413 }
 0x12b   : > { %417 = vst.msk [vmem:[#allocation4 + $0x8] sm:$0xff] %vm392_vm1, %v414_v8 }
 0x132   : > { %v419_v9 = vpop.permute.xlu2 %418 }
 0x133   : > { %422 = vst.msk [vmem:[#allocation2 + $0x10] sm:$0xff] %vm392_vm1, %v419_v9 }
 0x13a   : > { %v434_v10 = vpop.permute.xlu2 %433 }
 0x13b   : > { %437 = vst.msk [vmem:[#allocation2 + $0x18] sm:$0xff] %vm392_vm1, %v434_v10 }
 0x142   : > { %v404_v11 = vpop.permute.xlu1 %403 }
 0x143   : > { %407 = vst.msk [vmem:[#allocation2 + $0x8] sm:$0xff] %vm392_vm1, %v404_v11  ;;  %v396_v12 = vpop.permute.xlu0 %395 }
 0x144   : > { %398 = vst.msk [vmem:[#allocation3] sm:$0xff] %vm392_vm1, %v396_v12 }
 0x14a   : > { %v409_v13 = vpop.permute.xlu1 %408 }
 0x14b   : > { %412 = vst.msk [vmem:[#allocation3 + $0x8] sm:$0xff] %vm392_vm1, %v409_v13  ;;  %v400_v14 = vpop.permute.xlu0 %399 }
 0x14c   : > { %402 = vst.msk [vmem:[#allocation4] sm:$0xff] %vm392_vm1, %v400_v14 }
 0x152   : > { %v429_v15 = vpop.permute.xlu1 %428 }
 0x153   : > { %432 = vst.msk [vmem:[#allocation4 + $0x10] sm:$0xff] %vm392_vm1, %v429_v15  ;;  %v424_v16 = vpop.permute.xlu0 %423 }
 0x154   : > { %427 = vst.msk [vmem:[#allocation3 + $0x10] sm:$0xff] %vm392_vm1, %v424_v16 }
 0x15a   : > { %v444_v17 = vpop.permute.xlu1 %443 }
 0x15b   : > { %447 = vst.msk [vmem:[#allocation4 + $0x18] sm:$0xff] %vm392_vm1, %v444_v17  ;;  %v439_v18 = vpop.permute.xlu0 %438 }
 0x15c   : > { %442 = vst.msk [vmem:[#allocation3 + $0x18] sm:$0xff] %vm392_vm1, %v439_v18 }
 0x15d PF: > { %s1483_s16 = sshll.u32 %s1196_s5, 3  ;;  %s455_s3 = sld [smem:[#allocation6]]  ;;  %v1229_v19 = vmov 0   ;;  %vm465_vm3 = vcmask 64512  }
 0x15e   : > { %958 = vset.pattern.permute.xlu0 %v1229_v19  ;;  %s451_s20 = scalar_lea.vmem [#allocation3], %s1483_s16  ;;  %s449_s25 = scalar_lea.vmem [#allocation2], %s1483_s16 }
 0x15f   : > { %v450_v25 = vld [vmem:[%s449_s25] sm:$0xff]  ;;  %s453_s29 = scalar_lea.vmem [#allocation4], %s1483_s16  ;;  %s540_s10 = scalar_lea.vmem [#allocation5], %s1483_s16 }
 0x160   : > { %p803_p1 = scmp.ne.s32.totalorder %s1196_s5, 3 }
 0x161   : > { %s1230_s26 = smov (!%p803_p1), 8   ;;  %s1231_s14 = smov (!%p803_p1), 24  }
 0x162   : > { %v454_v33 = vld [vmem:[%s453_s29] sm:$0xff]  ;;  %s1232_s23 = smov (!%p803_p1), 16  }
 0x163   : > { %v452_v20 = vld [vmem:[%s451_s20] sm:$0xff]  ;;  %v457_v21 = vstv %s455_s3  ;;  %535 = vmatpush.msra.mxu1 %v454_v33 }
 0x164   : > { %vm456_vm2 = vcmp.eq.f32.partialorder %v452_v20, 0.0 }
 0x165   : > { %v458_v22 = vsel %vm456_vm2, %v457_v21, 1.0 }
 0x166   : > { %461 = vperm.xlu0 %958, %v458_v22  }
 0x1d8   : > { %v462_v23 = vpop.permute.xlu0 %461 }
 0x1d9   : > { %v464_v24 = vmul.f32 %v462_v23, %v452_v20 }
 0x1db   : > { %800 = vmatpush.xpose.msk.msra.mxu0 %vm465_vm3, %v464_v24 }
 0x1de   : > { %801 = vmatmul.msk.f32.vlgmr.msra.gmra.mxu0 %vm465_vm3, %v450_v25 }
 0x25b   : > { %v489_v26 = vpop.f32.mrf.mxu0 }
 0x25c   : > { %492 = vst.msk [vmem:[%s1596_s1] sm:$0xff] %vm465_vm3, %v489_v26  ;;  %v493_v27 = vsel %vm465_vm3, %v489_v26, -inf }
 0x25d   : > { %494 = vmax.xlane.f32.xlu0 %v493_v27 }
 0x2d0   : > { %v495_v28 = vpop.xlane.xlu0 %494 }
 0x2d1   : > { %v496_v29 = vsub.f32 %v489_v26, %v495_v28 }
 0x2d3   : > { %v497_v30 = vmul.f32 1.442695, %v496_v29 }
 0x2d5   : > { %959 = vpow2.f32 %v497_v30 }
 0x2db   : > { %v960_v31 = vpop.eup %959 }
 0x2dc   : > { %v499_v32 = vsel %vm465_vm3, %v960_v31, 0.0 }
 0x2dd   : > { %500 = vadd.xlane.f32.xlu1 %v499_v32 }
 0x350   : > { %v501_v34 = vpop.xlane.xlu1 %500 }
 0x351   : > { %961 = vrcp.f32 %v501_v34  ;;  %v513_v38 = vand.u32 2147483648, %v501_v34  ;;  %v511_v40 = vand.u32 2147483647, %v501_v34  ;;  %vm507_vm5 = vweird.f32 %v501_v34 }
 0x353   : > { %v514_v42 = vor.u32 1.1754944e-38, %v513_v38  ;;  %vm512_vm7 = vcmp.eq.f32.partialorder %v511_v40, 8.507059e+37 }
 0x357   : > { %v962_v35 = vpop.eup %961 }
 0x358   : > { %v503_v36 = vmul.f32 %v962_v35, %v501_v34  ;;  %vm508_vm4 = vweird.f32 %v962_v35 }
 0x359   : > { %vm509_vm6 = vmor %vm507_vm5, %vm508_vm4 }
 0x35a   : > { %v504_v37 = vsub.f32 1.0, %v503_v36 }
 0x35c   : > { %v505_v39 = vmul.f32 %v962_v35, %v504_v37 }
 0x35e   : > { %v506_v41 = vadd.f32 %v962_v35, %v505_v39 }
 0x360   : > { %v510_v43 = vsel %vm509_vm6, %v962_v35, %v506_v41 }
 0x361   : > { %v515_v44 = vsel %vm512_vm7, %v514_v42, %v510_v43 }
 0x362   : > { %v516_v45 = vmul.f32 %v960_v31, %v515_v44 }
 0x364   : > { %802 = vmatmul.msk.f32.vlgmr.msra.gmra.mxu1 %vm465_vm3, %v516_v45 }
 0x3de   : > { %545 = sbr.rel (%p803_p1) target bundleno = 1256 (0x4e8), region = 64 }
 0x3e1   : > { %v537_v46 = vpop.f32.mrf.mxu1 }
 0x3e2   : > { %541 = vst.msk [vmem:[%s540_s10] sm:$0xff] %vm465_vm3, %v537_v46 }
 0x3e3   : > { %v573_v50 = vld [vmem:[#allocation12 + $0x18] sm:$0xff]  ;;  %v572_v51 = vld [vmem:[#allocation12 + $0x10] sm:$0xff]  ;;  %v571_v52 = vld [vmem:[#allocation12 + $0x8] sm:$0xff]  ;;  %vm566_vm8 = vcmask 130048   ;;  %vm568_vm9 = vcmask 195584   ;;  %vm578_vm10 = vcmask 261120  }
 0x3e4   : > { %594 = vmatpush.msra.mxu0 %v573_v50  ;;  %v570_v53 = vld [vmem:[#allocation12] sm:$0xff]  ;;  %v963_v61 = vld [vmem:[%s1583_s4] ss:$0 sm:$0xff] }
 0x3e6   : > { %595 = vmatpush.msra.mxu0 %v572_v51 }
 0x3e8   : > { %596 = vmatpush.msra.mxu0 %v571_v52 }
 0x3e9   : > { %v548_v47 = vld [vmem:[#allocation5 + $0x8] sm:$0xff]  ;;  %v552_v48 = vld [vmem:[#allocation5 + $0x18] sm:$0xff]  ;;  %v550_v49 = vld [vmem:[#allocation5 + $0x10] sm:$0xff] }
 0x3ea   : > { %554 = vrot.lane.b32.xlu0 %v548_v47, %s1230_s26  ;;  %562 = vrot.lane.b32.xlu1 %v552_v48, %s1231_s14  ;;  %v546_v55 = vld [vmem:[#allocation5] sm:$0xff] }
 0x3eb   : > { %597 = vmatpush.msra.mxu0 %v570_v53 }
 0x3f2   : > { %558 = vrot.lane.b32.xlu0 %v550_v49, %s1232_s23 }
 0x45c   : > { %v555_v54 = vpop.permute.xlu0 %554  ;;  %v563_v56 = vpop.permute.xlu1 %562 }
 0x45d   : > { %v565_v57 = vsel %vm465_vm3, %v546_v55, %v555_v54 }
 0x464   : > { %v559_v58 = vpop.permute.xlu0 %558 }
 0x465   : > { %v567_v59 = vsel %vm566_vm8, %v565_v57, %v559_v58 }
 0x466   : > { %v569_v60 = vsel %vm568_vm9, %v567_v59, %v563_v56 }
 0x467   : > { %804 = vmatmul.msk.f32.vlgmr.msra.gmra.mxu0 %vm578_vm10, %v569_v60 }
 0x4e4   : > { %v599_v62 = vpop.f32.mrf.mxu0 }
 0x4e5   : > { %v600_v63 = vadd.f32 %v963_v61, %v599_v62 }
 0x4e7   : > { %602 = vst.msk [vmem:[%s1463_s22] sm:$0xff] %vm578_vm10, %v600_v63 }
 0x4e8 PF: > { %s807_s3 = sshll.u32 %s1200_s9, 3  ;;  %s621_s10 = sshll.u32 %s1463_s22, 4  ;;  %s622_s10 = int_to_ptr.vmem [resolvable:$true] %s621_s10 }
 0x4e9   : > { %s619_s29 = scalar_lea.hbm %s1585_s6, %s807_s3  ;;  %s604_s14 = scalar_lea.sflag [#allocation9], %s1446_s11 }
 0x4ea   : > { %s623_s26 = sshll.u32 %s619_s29, 4  ;;  %p1624_p12 = scmp.ne.s32.totalorder %s1614_s24, 0  ;;  %s624_s26 = int_to_ptr.hbm [resolvable:$true] %s623_s26 }
 0x4eb   : > { %s1068_s23 = sshra.s32 %s624_s26, 4  ;;  %s1074_s1 = scalar_lea.hbm %s1585_s6, 16  ;;  %s1069_s23 = int_to_ptr.hbm [resolvable:$true] %s1068_s23 }
 0x4ec   : > { %s1070_s15 = scalar_lea.hbm %s1069_s23, 8  ;;  %p1075_p5 = scmp.lt.s32.totalorder %s1069_s23, %s1585_s6 }
 0x4ed   : > { %p1071_p11 = scmp.ne.s32.totalorder %s1069_s23, %s1070_s15  ;;  %p1076_p6 = scmp.lt.s32.totalorder %s1074_s1, %s1070_s15 }
 0x4ef   : > { %p1072_p13 = pnand %p1071_p11, %p1624_p12  ;;  %p1077_p9 = por %p1076_p6, %p1075_p5 }
 0x4f1   : > { %p1073_p0 = pneg %p1072_p13 }
 0x4f3   : > { %p1078_p7 = pnand %p1077_p9, %p1073_p0 }
 0x4f5   : > { %1081 = shalt.err (!%p1078_p7)
}
 0x4f6   : > { %822 = dma.vmem_to_hbm [thread:$0]  (%p1624_p12), %s622_s10, 128, %s624_s26, %s604_s14  }
 0x4f7   : > { %s808_s11 = sshll.u32 %s1200_s9, 2  ;;  %s1625_s22 = scalar_lea.vmem [#allocation14], %s1461_s21 }
 0x4f8   : > { %s637_s18 = sshll.u32 %s1625_s22, 4  ;;  %s633_s3 = sadd.s32 %s1196_s5, %s808_s11  ;;  %s638_s18 = int_to_ptr.vmem [resolvable:$true] %s637_s18 }
 0x4f9   : > { %s809_s20 = sshll.u32 %s633_s3, 3  ;;  %s1626_s29 = sand.u32 1, %s1176_s27  }
 0x4fa   : > { %s635_s2 = scalar_lea.hbm %s1586_s7, %s809_s20  ;;  %s609_s24 = scalar_lea.sflag [#allocation15], %s1626_s29 }
 0x4fb   : > { %s639_s1 = sshll.u32 %s635_s2, 4  ;;  %s1102_s5 = scalar_lea.hbm %s1586_s7, 64  ;;  %s640_s1 = int_to_ptr.hbm [resolvable:$true] %s639_s1 }
 0x4fc   : > { %s1096_s23 = sshra.s32 %s640_s1, 4  ;;  %s1097_s23 = int_to_ptr.hbm [resolvable:$true] %s1096_s23 }
 0x4fd   : > { %s1098_s15 = scalar_lea.hbm %s1097_s23, 8  ;;  %p1103_p11 = scmp.lt.s32.totalorder %s1097_s23, %s1586_s7 }
 0x4fe   : > { %p1099_p10 = scmp.ne.s32.totalorder %s1097_s23, %s1098_s15  ;;  %p1104_p12 = scmp.lt.s32.totalorder %s1102_s5, %s1098_s15 }
 0x500   : > { %p1100_p3 = pnand %p1099_p10, %p1425_p8  ;;  %p1105_p13 = por %p1104_p12, %p1103_p11 }
 0x502   : > { %p1101_p1 = pneg %p1100_p3 }
 0x504   : > { %p1106_p0 = pnand %p1105_p13, %p1101_p1 }
 0x506   : > { %1109 = shalt.err (!%p1106_p0)
}
 0x507   : > { %823 = dma.vmem_to_hbm [thread:$0]  (%p1425_p8), %s638_s18, 128, %s640_s1, %s609_s24  }
 0x508 PF: > { %s1627_s14 = sld [smem:[#allocation21_spill]]  ;;  %p849_p5 = scmp.ge.s32.totalorder %s1212_s12, 2 }
 0x50a   : > { %p838_p6 = pnand %p849_p5, %p1399_p4 }
 0x50c   : > { %p839_p9 = pneg %p838_p6 }
 0x50e   : > { %s651_s16 = sand.u32 1, %s1627_s14  }
 0x50f   : > { %s652_s11 = scalar_lea.sflag [#allocation9], %s651_s16 }
 0x510   : > { %1163 = dma.done.wait (%p839_p9), %s652_s11, 128  }
 0x511   : > { %1165 = vsyncadd (%p839_p9), %s652_s11, 4294967168  ;;  %s1628_s22 = sld [smem:[#allocation20_spill]]  ;;  %p841_p7 = pnand %p849_p5, %p1431_p2 }
 0x513   : > { %p842_p10 = pneg %p841_p7 }
 0x517   : > { %s661_s3 = sand.u32 1, %s1628_s22  }
 0x518   : > { %s662_s19 = scalar_lea.sflag [#allocation15], %s661_s3 }
 0x519   : > { %1167 = dma.done.wait (%p842_p10), %s662_s19, 128  }
 0x51a   : > { %1169 = vsyncadd (%p842_p10), %s662_s19, 4294967168  ;;  %s29_s12 = sadd.s32 1, %s1212_s12   ;;  %s1629_s17 = sld [smem:[#allocation27_spill]] }
 0x51b   : > { %p26_p8 = scmp.ge.s32.totalorder %s29_s12, 10   ;;  %s1630_s18 = sld [smem:[#allocation26_spill]] }
 0x51c   : > { %s1631_s5 = sld [smem:[#allocation22_spill]]  ;;  %s1635_s26 = smov %s1176_s27 }
 0x51d   : > { %s1632_s9 = sld [smem:[#allocation23_spill]]  ;;  %s1636_s27 = smov %s1180_s28 }
 0x51e   : > { %s1633_s10 = sld [smem:[#allocation24_spill]]  ;;  %s1638_s29 = smov %s1188_s30 }
 0x51f   : > { %s1634_s11 = sld [smem:[#allocation25_spill]]  ;;  %s1639_s30 = smov %s1192_s8 }
 0x520   : > { %s1637_s28 = smov %s1629_s17  ;;  %28 = sbr.rel (!%p26_p8) target bundleno = 18 (0x12), region = 138 }
 0x521   : > { %s1640_s8 = smov %s1630_s18 }
 0x525   :  { %668 = vsyncpa [#allocation8], 1 }
 0x526   :  { %670 = vsyncpa [#allocation8 + $0x1], 1 }
 0x527   :  { %671 = vsyncpa [#allocation11], 1 }
 0x528   :  { %672 = vsyncpa [#allocation9], 1 }
 0x529   :  { %674 = vsyncpa [#allocation9 + $0x1], 1 }
 0x52a   :  { %675 = vsyncpa [#allocation15], 1 }
 0x52b   :  { %677 = vsyncpa [#allocation15 + $0x1], 1 }

</bundles_post_ra>
